<compile_context>
chip_gen: v7x
topology: tpu7x:2x2x1
jax: 0.10.0
libtpu: 0.0.40
codegen_flags: <defaults>
</compile_context>

<pallas_src>
import functools
import math

import jax
import jax.numpy as jnp
from jax import lax
from jax.experimental import pallas as pl
from jax.experimental.pallas import tpu as pltpu


def _round_up(x, m):
    return (x + m - 1) // m * m


def _pick_tile(n_pad, preferred):
    for t in (preferred, 512, 256, 128):
        if t <= n_pad and n_pad % t == 0:
            return t
    return n_pad


def _const_block_spec(shape):
    """Grid-invariant (resident) block: single-buffer it when supported."""
    index_map = lambda i: (0,) * len(shape)
    if hasattr(pl, "Buffered"):
        try:
            return pl.BlockSpec(shape, index_map, pipeline_mode=pl.Buffered(1))
        except TypeError:
            pass  # older jax without pipeline_mode kwarg
    return pl.BlockSpec(shape, index_map)


def _vmem_bytes(entries):
    total = 0
    for shape, dtype, nbuf in entries:
        total += math.prod(shape) * jnp.dtype(dtype).itemsize * nbuf
    return total


def _compiler_params(vmem_needed):
    # TODO(synk): raise the cap toward ~100 MiB on v5e/v6e (128 MiB physical);
    # 56 MiB is the safe ceiling shared with v7x's 64 MiB VMEM.
    limit = int(min(max(vmem_needed + (4 << 20), 16 << 20), 56 << 20))
    return pltpu.CompilerParams(
        dimension_semantics=("parallel",),
        vmem_limit_bytes=limit,
    )


# ------------------------------ GCN layer kernel ------------------------------
def _gcn_layer_kernel(*refs, apply_relu, apply_mask):
    a_ref, h_ref, wt_ref, b_ref = refs[:4]          # A row-tile / H / W^T / bias
    idx = 4
    mask_ref = None
    if apply_mask:
        mask_ref = refs[idx]
        idx += 1
    o_ref = refs[idx]

    # message passing: sum over neighbours == A[rows, :] @ H   (MXU, f32 acc)
    agg = jnp.dot(a_ref[...], h_ref[...], preferred_element_type=jnp.float32)
    # node apply: Linear                                         (MXU, f32 acc)
    out = jnp.dot(agg.astype(jnp.bfloat16), wt_ref[...],
                  preferred_element_type=jnp.float32)
    out = out + b_ref[...]
    if apply_relu:
        out = jnp.maximum(out, 0.0)                 # ReLU in f32 (VPU)
    if apply_mask:
        out = out * mask_ref[...]                   # fused decoder dropout
    o_ref[...] = out.astype(o_ref.dtype)


def _gcn_layer(a_p, h_p, wt_p, b_p, *, apply_relu, mask_p, tile_rows):
    n_pad = a_p.shape[0]
    f_in = h_p.shape[1]
    f_out = wt_p.shape[1]
    grid = (n_pad // tile_rows,)

    in_specs = [
        pl.BlockSpec((tile_rows, n_pad), lambda i: (i, 0)),   # A streamed rows
        _const_block_spec((n_pad, f_in)),                     # H resident
        _const_block_spec((f_in, f_out)),                     # W^T resident
        _const_block_spec((1, f_out)),                        # bias resident
    ]
    inputs = [a_p, h_p, wt_p, b_p]
    if mask_p is not None:
        in_specs.append(pl.BlockSpec((tile_rows, f_out), lambda i: (i, 0)))
        inputs.append(mask_p)

    vmem_needed = _vmem_bytes([
        ((tile_rows, n_pad), jnp.bfloat16, 2),    # A row tile (double buffered)
        ((n_pad, f_in), jnp.bfloat16, 1),         # resident H
        ((f_in, f_out), jnp.bfloat16, 1),         # resident W^T
        ((1, f_out), jnp.float32, 1),             # bias
        ((tile_rows, f_out), jnp.float32, 2),     # mask tile (counted always)
        ((tile_rows, f_out), jnp.bfloat16, 2),    # output tile
        ((tile_rows, f_in), jnp.float32, 2),      # in-kernel f32 intermediates
        ((tile_rows, f_out), jnp.float32, 2),
    ])

    kernel = functools.partial(
        _gcn_layer_kernel, apply_relu=apply_relu, apply_mask=mask_p is not None)

    return pl.pallas_call(
        kernel,
        grid=grid,
        in_specs=in_specs,
        out_specs=pl.BlockSpec((tile_rows, f_out), lambda i: (i, 0)),
        out_shape=jax.ShapeDtypeStruct((n_pad, f_out), jnp.bfloat16),
        compiler_params=_compiler_params(vmem_needed),
    )(*inputs)


# --------------------------- inner-product decoder ---------------------------
def _inner_product_kernel(z_rows_ref, z_all_ref, o_ref):
    # NT contraction over the feature axis (no explicit transpose of z)
    adj_tile = lax.dot_general(
        z_rows_ref[...], z_all_ref[...],
        dimension_numbers=(((1,), (1,)), ((), ())),
        preferred_element_type=jnp.float32)
    o_ref[...] = adj_tile.astype(o_ref.dtype)      # decoder activation = identity


def _inner_product_decoder(z_p, *, tile_m, out_dtype):
    n_pad, f_last = z_p.shape
    grid = (n_pad // tile_m,)

    vmem_needed = _vmem_bytes([
        ((tile_m, f_last), jnp.bfloat16, 2),       # z row tile
        ((n_pad, f_last), jnp.bfloat16, 1),        # resident z
        ((tile_m, n_pad), out_dtype, 2),           # lane-dense output tile
        ((tile_m, n_pad), jnp.float32, 2),         # f32 accumulate intermediate
    ])

    return pl.pallas_call(
        _inner_product_kernel,
        grid=grid,
        in_specs=[
            pl.BlockSpec((tile_m, f_last), lambda i: (i, 0)),
            _const_block_spec((n_pad, f_last)),
        ],
        out_specs=pl.BlockSpec((tile_m, n_pad), lambda i: (i, 0)),
        out_shape=jax.ShapeDtypeStruct((n_pad, n_pad), out_dtype),
        compiler_params=_compiler_params(vmem_needed),
    )(z_p, z_p)


# --------------------------------- wrapper ----------------------------------
def gae_forward(adj, feats, params, *, dropout_p=0.1, seed=0,
                tile_rows=256, tile_m=256, out_dtype=jnp.float32):
    """adj: (N, N) dense adjacency (A[dst, src] = 1); feats: (N, in_dim).

    Returns the (N, N) reconstructed adjacency (identity decoder activation).
    Set out_dtype=jnp.bfloat16 to halve the decoder's HBM writeback if the
    downstream loss tolerates it.
    """
    n = adj.shape[0]
    num_layers = len(params)
    feat_dims = [feats.shape[1]] + [w.shape[0] for (w, _) in params]

    # (8, 128) alignment: pad N (also the output's last dim) and every feature
    # dim to lane multiples so all loads/stores are full-width.
    n_pad = _round_up(n, 128)
    f_pad = [_round_up(d, 128) for d in feat_dims]
    tile_rows = _pick_tile(n_pad, tile_rows)
    tile_m = _pick_tile(n_pad, tile_m)

    a_p = jnp.zeros((n_pad, n_pad), jnp.bfloat16).at[:n, :n].set(
        adj.astype(jnp.bfloat16))
    h_p = jnp.zeros((n_pad, f_pad[0]), jnp.bfloat16).at[:n, :feat_dims[0]].set(
        feats.astype(jnp.bfloat16))

    # Dropout (F.dropout training semantics) on the decoder input: a scaled
    # keep-mask built host-side with jax.random and fused (one multiply) into
    # the last encoder layer's output.
    # TODO(synk): on a pure-TPU deployment this could use the in-kernel
    # hardware PRNG (pltpu.prng_seed / prng_random_bits); that primitive does
    # not lower in CPU/interpret environments, so the mask is an input here.
    mask_p = None
    if dropout_p > 0.0:
        key = jax.random.PRNGKey(seed)
        keep = jax.random.bernoulli(key, 1.0 - dropout_p, (n, feat_dims[-1]))
        mask = keep.astype(jnp.float32) / jnp.float32(1.0 - dropout_p)
        mask_p = jnp.zeros((n_pad, f_pad[-1]), jnp.float32).at[
            :n, :feat_dims[-1]].set(mask)

    # ------------------------------- encoder -------------------------------
    # TODO(synk): for graphs where the resident (N_pad, F_in) H no longer fits
    # VMEM, add a K reduction grid axis over column tiles of A / row tiles of H.
    h = h_p
    for l, (w, b) in enumerate(params):
        fin, fout = f_pad[l], f_pad[l + 1]
        wt = jnp.zeros((fin, fout), jnp.bfloat16).at[
            :w.shape[1], :w.shape[0]].set(w.T.astype(jnp.bfloat16))
        bb = jnp.zeros((1, fout), jnp.float32).at[0, :b.shape[0]].set(
            b.astype(jnp.float32))
        last = (l == num_layers - 1)
        h = _gcn_layer(a_p, h, wt, bb,
                       apply_relu=not last,
                       mask_p=mask_p if last else None,
                       tile_rows=tile_rows)

    # ------------------------------- decoder -------------------------------
    out_p = _inner_product_decoder(h, tile_m=tile_m, out_dtype=out_dtype)
    return out_p[:n, :n]


# --------------------------- params / reference ------------------------------
def init_gae_params(key, in_dim, hidden_dims):
    """Deterministic nn.Linear-style init: U(-1/sqrt(in), 1/sqrt(in))."""
    dims = [in_dim] + list(hidden_dims)
    params = []
    for i in range(len(hidden_dims)):
        fan_in, fan_out = dims[i], dims[i + 1]
        key, kw, kb = jax.random.split(key, 3)
        bound = 1.0 / float(fan_in) ** 0.5
        w = jax.random.uniform(kw, (fan_out, fan_in), jnp.float32, -bound, bound)
        b = jax.random.uniform(kb, (fan_out,), jnp.float32, -bound, bound)
        params.append((w, b))
    return params


def _reference_forward(adj, feats, params):
    """Pure-JAX f32 reference (dropout disabled) for a sanity check."""
    h = feats
    for i, (w, b) in enumerate(params):
        h = adj @ h                      # copy_u + sum aggregation
        h = h @ w.T + b                  # Linear
        if i != len(params) - 1:
            h = jnp.maximum(h, 0.0)      # ReLU (last layer: identity)
    return h @ h.T                       # identity decoder activation


if __name__ == "__main__":
    N, IN_DIM = 8, 16
    HIDDEN_DIMS = (32, 16)
    DROPOUT_P = 0.1

    root = jax.random.PRNGKey(0)
    k_adj, k_feat, k_param = jax.random.split(root, 3)

    # random sparse-ish directed graph with self-loops, as a dense 0/1 matrix
    adj = jax.random.bernoulli(k_adj, 0.3, (N, N)).astype(jnp.float32)
    adj = jnp.maximum(adj, jnp.eye(N, dtype=jnp.float32))
    feats = jax.random.normal(k_feat, (N, IN_DIM), jnp.float32)
    params = init_gae_params(k_param, IN_DIM, HIDDEN_DIMS)

    # sanity check vs pure-JAX reference with dropout disabled
    # (bf16 matmul inputs with f32 accumulation => loose tolerance)
    got = gae_forward(adj, feats, params, dropout_p=0.0, seed=0)
    ref = _reference_forward(adj, feats, params)
    assert got.shape == ref.shape
    assert jnp.allclose(got, ref, rtol=5e-2, atol=5e-1), (
        f"max abs err {float(jnp.max(jnp.abs(got - ref)))}")

    # real forward pass with dropout (host-generated mask; training semantics)
    adj_rec = gae_forward(adj, feats, params, dropout_p=DROPOUT_P, seed=1234)
    jax.block_until_ready(adj_rec)
    assert adj_rec.shape == (N, N) and adj_rec.dtype == jnp.float32
    assert bool(jnp.all(jnp.isfinite(adj_rec)))
    print("KERNEL_OK")
</pallas_src>

<mosaic_0001>
module attributes {stable_mosaic.version = 11 : i64} {
  func.func @_gcn_layer_kernel(%arg0: i32, %arg1: memref<128x128xbf16, #tpu.memory_space<vmem>>, %arg2: memref<128x128xbf16, #tpu.memory_space<vmem>>, %arg3: memref<128x128xbf16, #tpu.memory_space<vmem>>, %arg4: memref<1x128xf32, #tpu.memory_space<vmem>>, %arg5: memref<128x128xbf16, #tpu.memory_space<vmem>>) attributes {dimension_semantics = [#tpu.dimension_semantics<parallel>], iteration_bounds = array<i64: 1>, scalar_prefetch = 0 : i64, scratch_operands = 0 : i64, tpu.core_type = #tpu.core_type<tc>, window_params = [{transform_indices = @transform_0, window_bounds = array<i64: 128, 128>}, {pipeline_mode = #tpu.pipeline_mode<synchronous>, transform_indices = @transform_1, window_bounds = array<i64: 128, 128>}, {pipeline_mode = #tpu.pipeline_mode<synchronous>, transform_indices = @transform_2, window_bounds = array<i64: 128, 128>}, {pipeline_mode = #tpu.pipeline_mode<synchronous>, transform_indices = @transform_3, window_bounds = array<i64: 1, 128>}, {transform_indices = @transform_4, window_bounds = array<i64: 128, 128>}]} {
    %c0 = arith.constant 0 : index
    %c0_0 = arith.constant 0 : index
    %0 = vector.load %arg1[%c0, %c0_0] : memref<128x128xbf16, #tpu.memory_space<vmem>>, vector<128x128xbf16>
    %c0_1 = arith.constant 0 : index
    %c0_2 = arith.constant 0 : index
    %1 = vector.load %arg2[%c0_1, %c0_2] : memref<128x128xbf16, #tpu.memory_space<vmem>>, vector<128x128xbf16>
    %cst = arith.constant dense<0.000000e+00> : vector<128x128xf32>
    %2 = tpu.matmul %0, %1, %cst {dimension_numbers = #tpu.dot_dimension_numbers<[1], [0], [0], [1], [0, 0, 1, 1], [], []>} : vector<128x128xbf16>, vector<128x128xbf16>, vector<128x128xf32> -> vector<128x128xf32>
    %3 = arith.truncf %2 : vector<128x128xf32> to vector<128x128xbf16>
    %c0_3 = arith.constant 0 : index
    %c0_4 = arith.constant 0 : index
    %4 = vector.load %arg3[%c0_3, %c0_4] : memref<128x128xbf16, #tpu.memory_space<vmem>>, vector<128x128xbf16>
    %cst_5 = arith.constant dense<0.000000e+00> : vector<128x128xf32>
    %5 = tpu.matmul %3, %4, %cst_5 {dimension_numbers = #tpu.dot_dimension_numbers<[1], [0], [0], [1], [0, 0, 1, 1], [], []>} : vector<128x128xbf16>, vector<128x128xbf16>, vector<128x128xf32> -> vector<128x128xf32>
    %c0_6 = arith.constant 0 : index
    %c0_7 = arith.constant 0 : index
    %6 = vector.load %arg4[%c0_6, %c0_7] : memref<1x128xf32, #tpu.memory_space<vmem>>, vector<1x128xf32>
    %7 = vector.broadcast %6 : vector<1x128xf32> to vector<128x128xf32>
    %8 = arith.addf %5, %7 : vector<128x128xf32>
    %cst_8 = arith.constant 0.000000e+00 : f32
    %9 = vector.broadcast %cst_8 : f32 to vector<128x128xf32>
    %10 = arith.maximumf %8, %9 : vector<128x128xf32>
    %11 = arith.truncf %10 : vector<128x128xf32> to vector<128x128xbf16>
    %c0_9 = arith.constant 0 : index
    %c0_10 = arith.constant 0 : index
    %12 = vector.load %arg5[%c0_9, %c0_10] : memref<128x128xbf16, #tpu.memory_space<vmem>>, vector<128x128xbf16>
    tpu.vector_store %arg5[%c0_9, %c0_10], %11 {strides = array<i32>} : memref<128x128xbf16, #tpu.memory_space<vmem>>, vector<128x128xbf16>,
    return
  }
  func.func @transform_0(%arg0: i32) -> (i32, i32) {
    %c0_i32 = arith.constant 0 : i32
    %c0_i32_0 = arith.constant 0 : i32
    return %arg0, %c0_i32 : i32, i32
  }
  func.func @transform_1(%arg0: i32) -> (i32, i32) {
    %c0_i32 = arith.constant 0 : i32
    %c0_i32_0 = arith.constant 0 : i32
    %c0_i32_1 = arith.constant 0 : i32
    return %c0_i32, %c0_i32_0 : i32, i32
  }
  func.func @transform_2(%arg0: i32) -> (i32, i32) {
    %c0_i32 = arith.constant 0 : i32
    %c0_i32_0 = arith.constant 0 : i32
    %c0_i32_1 = arith.constant 0 : i32
    return %c0_i32, %c0_i32_0 : i32, i32
  }
  func.func @transform_3(%arg0: i32) -> (i32, i32) {
    %c0_i32 = arith.constant 0 : i32
    %c0_i32_0 = arith.constant 0 : i32
    %c0_i32_1 = arith.constant 0 : i32
    return %c0_i32, %c0_i32_0 : i32, i32
  }
  func.func @transform_4(%arg0: i32) -> (i32, i32) {
    %c0_i32 = arith.constant 0 : i32
    %c0_i32_0 = arith.constant 0 : i32
    return %arg0, %c0_i32 : i32, i32
  }
}

</mosaic_0001>

<bundles_post_ra>
// kernel: tpu_custom_call.1
= control target key start
LH: loop header
LB: loop body
LE: loop exit
PB: predicated region body
PF: predicated region fallthrough
CT: control target
= control target key end

     0   :  { %9 = vsyncpa [#allocation3], 0  ;;  %s1000_s0 = inlined_call_operand.hbm [shape: bf16[128,128], index: 0, kind: input, shape index: {}]   ;;  %s1001_s1 = inlined_call_operand.hbm [shape: bf16[128,128], index: 1, kind: input, shape index: {}]   ;;  %s1002_s2 = inlined_call_operand.hbm [shape: bf16[128,128], index: 2, kind: input, shape index: {}]   ;;  %s1003_s3 = inlined_call_operand.vmem [shape: f32[1,128], index: 3, kind: input, shape index: {}]   ;;  %s1004_s4 = inlined_call_operand.hbm [shape: bf16[128,128], index: 4, kind: output, shape index: {}]  }
   0x1   :  { %10 = vsyncpa [#allocation6], 0 }
   0x2   :  { %11 = vsyncpa [#allocation4], 0  ;;  %s899_s15 = smov [#allocation5]   ;;  %s900_s17 = smov [#allocation2]  }
   0x3   :  { %s29_s16 = sshll.u32 %s899_s15, 4  ;;  %s17_s18 = sshll.u32 %s900_s17, 4  ;;  %s30_s16 = int_to_ptr.vmem [resolvable:$true] %s29_s16  ;;  %s930_s18 = int_to_ptr.vmem [resolvable:$true] %s17_s18 }
   0x4   :  { %s805_s21 = scalar_lea.hbm %s1001_s1, 1024 }
   0x5   :  { %p806_p0 = scmp.ne.s32.totalorder %s1001_s1, %s805_s21  ;;  %p809_p1 = scmp.lt.u32.totalorder %s805_s21, %s1001_s1 }
   0x7   :  { %p811_p2 = pnand %p809_p1, %p806_p0 }
   0x9   :  { %814 = shalt.err (!%p811_p2)
}
   0xa   :  { %s815_s26 = scalar_lea.vmem %s30_s16, 1024  ;;  %p820_p4 = scmp.lt.s32.totalorder %s30_s16, %s30_s16 }
   0xb   :  { %p816_p3 = scmp.ne.s32.totalorder %s30_s16, %s815_s26  ;;  %p821_p5 = scmp.lt.s32.totalorder %s815_s26, %s815_s26 }
   0xd   :  { %p822_p6 = por %p821_p5, %p820_p4 }
   0xf   :  { %p823_p7 = pnand %p822_p6, %p816_p3 }
  0x11   :  { %826 = shalt.err (!%p823_p7)
}
  0x12   :  { %s901_s27 = smov 64   ;;  %s902_s28 = smov 4  }
  0x13   :  { %35 = dma.hbm_to_vmem [thread:$0]  %s1001_s1, 1024, %s30_s16, [#allocation6], %s901_s27, %s901_s27, %s902_s28  }
  0x14   :  { %s827_s7 = scalar_lea.hbm %s1000_s0, 1024 }
  0x15   :  { %p828_p8 = scmp.ne.s32.totalorder %s1000_s0, %s827_s7  ;;  %p831_p9 = scmp.lt.u32.totalorder %s827_s7, %s1000_s0 }
  0x17   :  { %p833_p10 = pnand %p831_p9, %p828_p8 }
  0x19   :  { %836 = shalt.err (!%p833_p10)
}
  0x1a   :  { %s837_s12 = scalar_lea.vmem %s930_s18, 1024  ;;  %p842_p12 = scmp.lt.s32.totalorder %s930_s18, %s930_s18 }
  0x1b   :  { %p838_p11 = scmp.ne.s32.totalorder %s930_s18, %s837_s12  ;;  %p843_p13 = scmp.lt.s32.totalorder %s837_s12, %s837_s12 }
  0x1d   :  { %p844_p0 = por %p843_p13, %p842_p12 }
  0x1f   :  { %p845_p1 = pnand %p844_p0, %p838_p11 }
  0x21   :  { %848 = shalt.err (!%p845_p1)
}
  0x22   :  { %23 = dma.hbm_to_vmem [thread:$0]  %s1000_s0, 1024, %s930_s18, [#allocation3], %s901_s27, %s901_s27, %s902_s28  }
  0x23   :  { %s903_s14 = smov [#allocation7]   ;;  %s849_s19 = scalar_lea.hbm %s1002_s2, 1024 }
  0x24   :  { %s41_s15 = sshll.u32 %s903_s14, 4  ;;  %p850_p2 = scmp.ne.s32.totalorder %s1002_s2, %s849_s19  ;;  %s42_s15 = int_to_ptr.vmem [resolvable:$true] %s41_s15 }
  0x25   :  { %p853_p3 = scmp.lt.u32.totalorder %s849_s19, %s1002_s2 }
  0x27   :  { %p855_p4 = pnand %p853_p3, %p850_p2 }
  0x29   :  { %858 = shalt.err (!%p855_p4)
}
  0x2a   :  { %s859_s24 = scalar_lea.vmem %s42_s15, 1024  ;;  %p864_p6 = scmp.lt.s32.totalorder %s42_s15, %s42_s15 }
  0x2b   :  { %p860_p5 = scmp.ne.s32.totalorder %s42_s15, %s859_s24  ;;  %p865_p7 = scmp.lt.s32.totalorder %s859_s24, %s859_s24 }
  0x2d   :  { %p866_p8 = por %p865_p7, %p864_p6 }
  0x2f   :  { %p867_p9 = pnand %p866_p8, %p860_p5 }
  0x31   :  { %870 = shalt.err (!%p867_p9)
}
  0x32   :  { %47 = dma.hbm_to_vmem [thread:$0]  %s1002_s2, 1024, %s42_s15, [#allocation6], %s901_s27, %s901_s27, %s902_s28  }
  0x33   :  { %893 = dma.done.wait [#allocation3], 1024  }
  0x34   :  { %894 = vsyncadd [#allocation3], 4294966272 }
  0x35   :  { %895 = dma.done.wait [#allocation6], 2048  }
  0x36   :  { %896 = vsyncadd [#allocation6], 4294965248  ;;  %v781_v0 = vld [vmem:[#allocation5] sm:$0xff]   ;;  %v782_v1 = vld [vmem:[#allocation5 + $0x8] sm:$0xff]  }
  0x37   :  { %711 = vmatprep.subr.bf16.mxu0 %v781_v0  ;;  %v783_v2 = vld [vmem:[#allocation5 + $0x10] sm:$0xff]   ;;  %v784_v3 = vld [vmem:[#allocation5 + $0x18] sm:$0xff]   ;;  %v789_v4 = vld [vmem:[#allocation2] sm:$0xff]  }
  0x38   :  { %712 = vmatpush3.bf16.msra.mxu0 %v781_v0  ;;  %727 = vmatprep.mubr.bf16.mxu0 %v789_v4  ;;  %v785_v5 = vld [vmem:[#allocation5 + $0x20] sm:$0xff]   ;;  %v786_v6 = vld [vmem:[#allocation5 + $0x28] sm:$0xff]   ;;  %v787_v9 = vld [vmem:[#allocation5 + $0x30] sm:$0xff]  }
  0x39   :  { %713 = vmatprep.subr.bf16.mxu0 %v782_v1  ;;  %v797_v7 = vld [vmem:[#allocation7] sm:$0xff]   ;;  %v798_v8 = vld [vmem:[#allocation7 + $0x8] sm:$0xff]   ;;  %v799_v10 = vld [vmem:[#allocation7 + $0x10] sm:$0xff]  }
  0x3a   :  { %743 = vmatprep.subr.bf16.mxu1 %v797_v7  ;;  %v788_v11 = vld [vmem:[#allocation5 + $0x38] sm:$0xff]   ;;  %v801_v13 = vld [vmem:[#allocation7 + $0x20] sm:$0xff]   ;;  %v790_v14 = vld [vmem:[#allocation2 + $0x8] sm:$0xff]  }
  0x3b   :  { %744 = vmatpush3.bf16.msra.mxu1 %v797_v7  ;;  %v800_v12 = vld [vmem:[#allocation7 + $0x18] sm:$0xff]   ;;  %v791_v15 = vld [vmem:[#allocation2 + $0x10] sm:$0xff]   ;;  %v802_v16 = vld [vmem:[#allocation7 + $0x28] sm:$0xff]  }
  0x3c   :  { %714 = vmatpush3.bf16.msra.mxu0 %v782_v1  ;;  %745 = vmatprep.subr.bf16.mxu1 %v798_v8  ;;  %v803_v17 = vld [vmem:[#allocation7 + $0x30] sm:$0xff]   ;;  %v792_v18 = vld [vmem:[#allocation2 + $0x18] sm:$0xff]   ;;  %v793_v19 = vld [vmem:[#allocation2 + $0x20] sm:$0xff]  }
  0x3d   :  { %715 = vmatprep.subr.bf16.mxu0 %v783_v2  ;;  %v794_v20 = vld [vmem:[#allocation2 + $0x28] sm:$0xff]   ;;  %v795_v21 = vld [vmem:[#allocation2 + $0x30] sm:$0xff]   ;;  %v796_v22 = vld [vmem:[#allocation2 + $0x38] sm:$0xff]  }
  0x3e   :  { %v804_v23 = vld [vmem:[#allocation7 + $0x38] sm:$0xff]   ;;  %v591_v48 = vld [vmem:[%s1003_s3] ss:$0 sm:$0xff]  ;;  %s904_s3 = smov [#allocation8]  }
  0x3f   :  { %746 = vmatpush3.bf16.msra.mxu1 %v798_v8  ;;  %s562_s26 = sshll.u32 %s904_s3, 4  ;;  %s563_s26 = int_to_ptr.vmem [resolvable:$true] %s562_s26 }
  0x40   :  { %716 = vmatpush3.bf16.msra.mxu0 %v783_v2  ;;  %747 = vmatprep.subr.bf16.mxu1 %v799_v10  ;;  %s871_s29 = scalar_lea.vmem %s563_s26, 1024  ;;  %p876_p11 = scmp.lt.s32.totalorder %s563_s26, %s563_s26 }
  0x41   :  { %717 = vmatprep.subr.bf16.mxu0 %v784_v3  ;;  %p872_p10 = scmp.ne.s32.totalorder %s563_s26, %s871_s29  ;;  %p877_p12 = scmp.lt.s32.totalorder %s871_s29, %s871_s29 }
  0x43   :  { %748 = vmatpush3.bf16.msra.mxu1 %v799_v10  ;;  %p878_p13 = por %p877_p12, %p876_p11 }
  0x44   :  { %718 = vmatpush3.bf16.msra.mxu0 %v784_v3  ;;  %749 = vmatprep.subr.bf16.mxu1 %v800_v12 }
  0x45   :  { %719 = vmatprep.subr.bf16.mxu0 %v785_v5  ;;  %p879_p0 = pnand %p878_p13, %p872_p10 }
  0x47   :  { %750 = vmatpush3.bf16.msra.mxu1 %v800_v12 }
  0x48   :  { %720 = vmatpush3.bf16.msra.mxu0 %v785_v5  ;;  %751 = vmatprep.subr.bf16.mxu1 %v801_v13 }
  0x49   :  { %721 = vmatprep.subr.bf16.mxu0 %v786_v6 }
  0x4b   :  { %752 = vmatpush3.bf16.msra.mxu1 %v801_v13 }
  0x4c   :  { %722 = vmatpush3.bf16.msra.mxu0 %v786_v6  ;;  %753 = vmatprep.subr.bf16.mxu1 %v802_v16 }
  0x4d   :  { %723 = vmatprep.subr.bf16.mxu0 %v787_v9 }
  0x4f   :  { %754 = vmatpush3.bf16.msra.mxu1 %v802_v16 }
  0x50   :  { %724 = vmatpush3.bf16.msra.mxu0 %v787_v9  ;;  %755 = vmatprep.subr.bf16.mxu1 %v803_v17 }
  0x51   :  { %725 = vmatprep.subr.bf16.mxu0 %v788_v11 }
  0x53   :  { %756 = vmatpush3.bf16.msra.mxu1 %v803_v17 }
  0x54   :  { %726 = vmatpush3.bf16.msra.mxu0 %v788_v11  ;;  %757 = vmatprep.subr.bf16.mxu1 %v804_v23 }
  0x57   :  { %728 = vmatmul.mubr.bf16.vlgmr.msra.gmra.mrb[0].mxu0 %v790_v14  ;;  %758 = vmatpush3.bf16.msra.mxu1 %v804_v23 }
  0x58   :  { %731 = vmatprep.mubr.bf16.mxu0 %v791_v15 }
  0x5f   :  { %732 = vmatmul.mubr.bf16.gmra.mrb[4].mxu0 %v792_v18 }
  0x60   :  { %735 = vmatprep.mubr.bf16.mxu0 %v793_v19 }
  0x67   :  { %736 = vmatmul.mubr.bf16.gmra.mrb[8].mxu0 %v794_v20 }
  0x68   :  { %739 = vmatprep.mubr.bf16.mxu0 %v795_v21 }
  0x6f   :  { %740 = vmatmul.mubr.bf16.gmra.mrb[12].mxu0 %v796_v22 }
 0x12a   :  { %v729_v24 = vpop.f32.mrb[0].mxu0 }
 0x12b   :  { %v222_v25 = vpop.f32.mrb[1].mxu0 }
 0x12c   :  { %v730_v26 = vpop.f32.mrb[2].mxu0 }
 0x12d   :  { %v286_v27 = vpack.c.bf16 %v730_v26, %v729_v24  ;;  %v225_v28 = vpop.f32.mrb[3].mxu0 }
 0x12e   :  { %v285_v29 = vpack.c.bf16 %v225_v28, %v222_v25 }
 0x130   :  { %759 = vmatprep.mubr.bf16.mxu1 %v285_v29 }
 0x131   :  { %760 = vmatmul.mubr.bf16.vlgmr.msra.gmra.mrb[0].mxu1 %v286_v27 }
 0x132   :  { %v733_v30 = vpop.f32.mrb[4].mxu0 }
 0x133   :  { %v238_v31 = vpop.f32.mrb[5].mxu0 }
 0x134   :  { %v734_v32 = vpop.f32.mrb[6].mxu0 }
 0x135   :  { %v288_v33 = vpack.c.bf16 %v734_v32, %v733_v30  ;;  %v241_v34 = vpop.f32.mrb[7].mxu0 }
 0x136   :  { %v287_v35 = vpack.c.bf16 %v241_v34, %v238_v31 }
 0x138   :  { %763 = vmatprep.mubr.bf16.mxu1 %v287_v35 }
 0x139   :  { %764 = vmatmul.mubr.bf16.gmra.mrb[4].mxu1 %v288_v33 }
 0x13a   :  { %v737_v36 = vpop.f32.mrb[8].mxu0 }
 0x13b   :  { %v254_v37 = vpop.f32.mrb[9].mxu0 }
 0x13c   :  { %v738_v38 = vpop.f32.mrb[10].mxu0 }
 0x13d   :  { %v290_v39 = vpack.c.bf16 %v738_v38, %v737_v36  ;;  %v257_v40 = vpop.f32.mrb[11].mxu0 }
 0x13e   :  { %v289_v41 = vpack.c.bf16 %v257_v40, %v254_v37 }
 0x140   :  { %767 = vmatprep.mubr.bf16.mxu1 %v289_v41 }
 0x141   :  { %768 = vmatmul.mubr.bf16.gmra.mrb[8].mxu1 %v290_v39 }
 0x142   :  { %v741_v42 = vpop.f32.mrb[12].mxu0 }
 0x143   :  { %v270_v43 = vpop.f32.mrb[13].mxu0 }
 0x144   :  { %v742_v44 = vpop.f32.mrb[14].mxu0 }
 0x145   :  { %v292_v45 = vpack.c.bf16 %v742_v44, %v741_v42  ;;  %v273_v46 = vpop.f32.mrb[15].mxu0 }
 0x146   :  { %v291_v47 = vpack.c.bf16 %v273_v46, %v270_v43 }
 0x148   :  { %771 = vmatprep.mubr.bf16.mxu1 %v291_v47 }
 0x149   :  { %772 = vmatmul.mubr.bf16.gmra.mrb[12].mxu1 %v292_v45 }
 0x204   :  { %v761_v49 = vpop.f32.mrb[0].mxu1 }
 0x205   :  { %v407_v50 = vadd.f32 %v761_v49, %v591_v48  ;;  %v398_v51 = vpop.f32.mrb[1].mxu1 }
 0x206   :  { %v399_v52 = vadd.f32 %v591_v48, %v398_v51  ;;  %v762_v53 = vpop.f32.mrb[2].mxu1 }
 0x207   :  { %v410_v54 = vadd.f32 %v762_v53, %v591_v48  ;;  %v401_v55 = vpop.f32.mrb[3].mxu1  ;;  %v463_v57 = vmax.f32 %v407_v50, 0.0 }
 0x208   :  { %v402_v56 = vadd.f32 %v591_v48, %v401_v55  ;;  %v461_v59 = vmax.f32 %v399_v52, 0.0 }
 0x209   :  { %v464_v58 = vmax.f32 %v410_v54, 0.0 }
 0x20a   :  { %v462_v60 = vmax.f32 %v402_v56, 0.0 }
 0x20b   :  { %v640_v61 = vpack.c.bf16 %v464_v58, %v463_v57 }
 0x20c   :  { %v635_v62 = vpack.c.bf16 %v462_v60, %v461_v59  ;;  %v765_v63 = vpop.f32.mrb[4].mxu1 }
 0x20d   :  { %672 = vst [vmem:[#allocation8 + $0x8] sm:$0xff] %v640_v61   ;;  %v423_v0 = vadd.f32 %v765_v63, %v591_v48  ;;  %v414_v1 = vpop.f32.mrb[5].mxu1 }
 0x20e   :  { %636 = vst [vmem:[#allocation8] sm:$0xff] %v635_v62   ;;  %v415_v2 = vadd.f32 %v591_v48, %v414_v1  ;;  %v766_v3 = vpop.f32.mrb[6].mxu1 }
 0x20f   :  { %v426_v4 = vadd.f32 %v766_v3, %v591_v48  ;;  %v417_v5 = vpop.f32.mrb[7].mxu1  ;;  %v467_v7 = vmax.f32 %v423_v0, 0.0 }
 0x210   :  { %v418_v6 = vadd.f32 %v591_v48, %v417_v5  ;;  %v465_v9 = vmax.f32 %v415_v2, 0.0 }
 0x211   :  { %v468_v8 = vmax.f32 %v426_v4, 0.0 }
 0x212   :  { %v466_v10 = vmax.f32 %v418_v6, 0.0 }
 0x213   :  { %v650_v11 = vpack.c.bf16 %v468_v8, %v467_v7 }
 0x214   :  { %v645_v12 = vpack.c.bf16 %v466_v10, %v465_v9  ;;  %v769_v13 = vpop.f32.mrb[8].mxu1 }
 0x215   :  { %674 = vst [vmem:[#allocation8 + $0x18] sm:$0xff] %v650_v11   ;;  %v439_v14 = vadd.f32 %v769_v13, %v591_v48  ;;  %v430_v15 = vpop.f32.mrb[9].mxu1 }
 0x216   :  { %673 = vst [vmem:[#allocation8 + $0x10] sm:$0xff] %v645_v12   ;;  %v431_v16 = vadd.f32 %v591_v48, %v430_v15  ;;  %v770_v17 = vpop.f32.mrb[10].mxu1 }
 0x217   :  { %v442_v18 = vadd.f32 %v770_v17, %v591_v48  ;;  %v433_v19 = vpop.f32.mrb[11].mxu1  ;;  %v471_v21 = vmax.f32 %v439_v14, 0.0 }
 0x218   :  { %v434_v20 = vadd.f32 %v591_v48, %v433_v19  ;;  %v469_v23 = vmax.f32 %v431_v16, 0.0 }
 0x219   :  { %v472_v22 = vmax.f32 %v442_v18, 0.0 }
 0x21a   :  { %v470_v24 = vmax.f32 %v434_v20, 0.0 }
 0x21b   :  { %v660_v25 = vpack.c.bf16 %v472_v22, %v471_v21 }
 0x21c   :  { %v655_v26 = vpack.c.bf16 %v470_v24, %v469_v23  ;;  %v773_v27 = vpop.f32.mrb[12].mxu1 }
 0x21d   :  { %676 = vst [vmem:[#allocation8 + $0x28] sm:$0xff] %v660_v25   ;;  %v455_v28 = vadd.f32 %v773_v27, %v591_v48  ;;  %v446_v29 = vpop.f32.mrb[13].mxu1 }
 0x21e   :  { %675 = vst [vmem:[#allocation8 + $0x20] sm:$0xff] %v655_v26   ;;  %v447_v30 = vadd.f32 %v591_v48, %v446_v29  ;;  %v774_v31 = vpop.f32.mrb[14].mxu1 }
 0x21f   :  { %v458_v32 = vadd.f32 %v774_v31, %v591_v48  ;;  %v449_v33 = vpop.f32.mrb[15].mxu1  ;;  %v475_v35 = vmax.f32 %v455_v28, 0.0 }
 0x220   :  { %v450_v34 = vadd.f32 %v591_v48, %v449_v33  ;;  %v473_v37 = vmax.f32 %v447_v30, 0.0 }
 0x221   :  { %v476_v36 = vmax.f32 %v458_v32, 0.0 }
 0x222   :  { %v474_v38 = vmax.f32 %v450_v34, 0.0 }
 0x223   :  { %v670_v39 = vpack.c.bf16 %v476_v36, %v475_v35 }
 0x224   :  { %v665_v40 = vpack.c.bf16 %v474_v38, %v473_v37 }
 0x225   :  { %678 = vst [vmem:[#allocation8 + $0x38] sm:$0xff] %v670_v39  }
 0x226   :  { %677 = vst [vmem:[#allocation8 + $0x30] sm:$0xff] %v665_v40  }
 0x227   :  { %882 = shalt.err (!%p879_p0)
}
 0x228   :  { %s883_s6 = scalar_lea.hbm %s1004_s4, 1024 }
 0x229   :  { %p884_p1 = scmp.ne.s32.totalorder %s1004_s4, %s883_s6  ;;  %p887_p2 = scmp.lt.u32.totalorder %s883_s6, %s1004_s4 }
 0x22b   :  { %p889_p3 = pnand %p887_p2, %p884_p1 }
 0x22d   :  { %892 = shalt.err (!%p889_p3)
}
 0x22e   :  { %568 = dma.vmem_to_hbm [thread:$0]  %s563_s26, 1024, %s1004_s4, [#allocation4], %s901_s27, %s901_s27, %s902_s28  }
 0x22f   :  { %897 = dma.done.wait [#allocation4], 1024  }
 0x230   :  { %898 = vsyncadd [#allocation4], 4294966272 }
 0x231   :  { %572 = vsyncpa [#allocation3], 1 }
 0x232   :  { %573 = vsyncpa [#allocation6], 1 }
 0x233   :  { %574 = vsyncpa [#allocation4], 1 }

</bundles_post_ra>
